<compile_context>
chip_gen: v7x
topology: tpu7x:2x2x1
jax: 0.10.0
libtpu: 0.0.40
codegen_flags: <defaults>
</compile_context>

<pallas_src>
import jax
import jax.numpy as jnp
from jax import lax
from jax.experimental import pallas as pl
from jax.experimental.pallas import tpu as pltpu


def _round_up(v, m):
    return (v + m - 1) // m * m


# ----------------------------- Pallas kernel ------------------------------- #

def moe_group_kernel(tile_expert_ref, n_valid_ref,
                     x_ref, w_ref, w13_ref, w2_ref, out_ref):
    """One grid step per row tile of the expert-grouped token matrix.

    tile_expert_ref : [n_tiles] int32 (SMEM) expert owning each row tile
    n_valid_ref     : [1]       int32 (SMEM) number of valid (non-padding) tiles
    x_ref   : [TM, H]  token rows, already grouped by expert (input dtype)
    w_ref   : [TM, 1]  f32 per-row routing weight (0 for padding rows)
    w13_ref : [H, 2I]  fused gate||up projection of this tile's expert (K-major)
    w2_ref  : [I, H]   down projection of this tile's expert (K-major)
    out_ref : [TM, H]  per-row expert output, already scaled by routing weight
    """
    t = pl.program_id(0)

    @pl.when(t < n_valid_ref[0])
    def _():
        x = x_ref[...]
        h = jnp.dot(x, w13_ref[...],
                    preferred_element_type=jnp.float32)          # [TM, 2I]
        i_dim = w2_ref.shape[0]
        h1 = h[:, :i_dim]                                        # gate_proj
        h3 = h[:, i_dim:]                                        # up_proj
        act = (h1 * jax.nn.sigmoid(h1)) * h3                     # SiLU(gate)*up, f32
        # Scale at [TM, I] (cheaper than [TM, H]); bf16 cast before down_proj is
        # a documented precision trade-off vs. the f32 reference.
        scaled = (act * w_ref[...]).astype(w2_ref.dtype)
        out_ref[...] = jnp.dot(scaled, w2_ref[...],
                               preferred_element_type=jnp.float32
                               ).astype(out_ref.dtype)

    @pl.when(t >= n_valid_ref[0])
    def _():
        out_ref[...] = jnp.zeros_like(out_ref)


# ------------------------------ JAX wrappers -------------------------------- #

def _choose_tiling(n_rows, hidden, intermediate, dtype):
    """Pick row-tile size and VMEM limit from the chip's VMEM capacity."""
    try:
        cap = int(getattr(pltpu.get_tpu_info(), "vmem_capacity_bytes", 64 << 20))
    except Exception:
        cap = 64 << 20
    tm_target = 512 if cap >= (96 << 20) else 256     # v5e/v6e: 128 MiB; v7x: 64 MiB
    tm = max(8, min(tm_target, _round_up(n_rows, 8)))
    bpe = jnp.dtype(dtype).itemsize
    w_bytes = 3 * intermediate * hidden * bpe          # fused w13 + w2 per expert
    xo_bytes = 2 * tm * hidden * bpe                   # x tile + out tile
    f32_scratch = tm * max(2 * intermediate, hidden) * 4
    budget = 2 * (w_bytes + xo_bytes) + f32_scratch + (4 << 20)
    vmem_limit = int(min(int(cap * 0.9), max(32 << 20, budget)))
    return tm, vmem_limit


def fused_moe_forward(x, topk_vals, topk_idx, w13_t, w2_t):
    """Grouped-GEMM fused MoE.

    x         : [T, H]     tokens
    topk_vals : [T, K] f32 routing weights (softmax probs, renormalize=False)
    topk_idx  : [T, K] int expert ids
    w13_t     : [E, H, 2I] fused gate||up, K-major
    w2_t      : [E, I, H]  down, K-major
    returns   : [T, H] in x.dtype
    """
    T, H = x.shape
    E, _, two_I = w13_t.shape
    I = two_I // 2
    K = topk_idx.shape[1]
    n_rows = T * K

    TM, vmem_limit = _choose_tiling(n_rows, H, I, x.dtype)

    # ---- Expert-grouped row schedule (static shapes, dynamic values) ----
    flat_expert = topk_idx.reshape(-1).astype(jnp.int32)              # [T*K]
    flat_weight = topk_vals.reshape(-1).astype(jnp.float32)           # [T*K]
    flat_token = jnp.repeat(jnp.arange(T, dtype=jnp.int32), K)        # [T*K]

    order = jnp.argsort(flat_expert, stable=True)                     # rows by expert
    sorted_expert = flat_expert[order]
    sorted_token = flat_token[order]
    sorted_weight = flat_weight[order]

    counts = jnp.bincount(flat_expert, length=E).astype(jnp.int32)    # [E]
    group_start = (jnp.cumsum(counts) - counts).astype(jnp.int32)
    padded_counts = (((counts + TM - 1) // TM) * TM).astype(jnp.int32)
    padded_start = (jnp.cumsum(padded_counts) - padded_counts).astype(jnp.int32)
    padded_total = jnp.sum(padded_counts)
    n_valid_tiles = (padded_total // TM).astype(jnp.int32)

    # Static upper bound on padded row tiles: each nonempty group costs at most
    # one extra partial tile -> min(E, n_rows) + n_rows // TM.
    max_tiles = min(E, n_rows) + n_rows // TM
    P = max_tiles * TM

    # Destination row of each sorted (token, expert) pair in the padded layout.
    within = jnp.arange(n_rows, dtype=jnp.int32) - group_start[sorted_expert]
    dest = padded_start[sorted_expert] + within                        # unique rows

    # Tile -> expert map.  Padding tiles repeat the last valid expert so their
    # weight block index is unchanged (DMA elided); compute gated by pl.when.
    tile_starts = jnp.arange(max_tiles, dtype=jnp.int32) * TM
    group_end = padded_start + padded_counts                           # [E]
    owner = jnp.sum(tile_starts[:, None] >= group_end[None, :],
                    axis=1).astype(jnp.int32)                          # [max_tiles]
    last_owner = jnp.take(owner, jnp.maximum(n_valid_tiles - 1, 0))
    tile_expert = jnp.where(jnp.arange(max_tiles) < n_valid_tiles, owner, last_owner)
    tile_expert = jnp.clip(tile_expert, 0, E - 1).astype(jnp.int32)

    # Gather rows into the grouped layout; scatter per-row routing weights
    # (padding rows keep weight 0 -> exact zero contribution).
    row_src = jnp.zeros((P,), jnp.int32).at[dest].set(sorted_token)
    x_grouped = jnp.take(x, row_src, axis=0)                           # [P, H]
    w_grouped = jnp.zeros((P, 1), jnp.float32).at[dest].set(sorted_weight[:, None])

    y_grouped = pl.pallas_call(
        moe_group_kernel,
        out_shape=jax.ShapeDtypeStruct((P, H), x.dtype),
        grid_spec=pltpu.PrefetchScalarGridSpec(
            num_scalar_prefetch=2,
            grid=(max_tiles,),
            in_specs=[
                pl.BlockSpec((TM, H), lambda t, te, nv: (t, 0)),               # tokens
                pl.BlockSpec((TM, 1), lambda t, te, nv: (t, 0)),               # route wt
                pl.BlockSpec((None, H, two_I), lambda t, te, nv: (te[t], 0, 0)),  # w13[e]
                pl.BlockSpec((None, I, H), lambda t, te, nv: (te[t], 0, 0)),      # w2[e]
            ],
            out_specs=pl.BlockSpec((TM, H), lambda t, te, nv: (t, 0)),
        ),
        compiler_params=pltpu.CompilerParams(
            dimension_semantics=("parallel",),   # independent row tiles -> megacore
            vmem_limit_bytes=vmem_limit,
        ),
    )(tile_expert, jnp.reshape(n_valid_tiles, (1,)),
      x_grouped, w_grouped, w13_t, w2_t)

    # Un-group: per (token, k) pick its padded row; sum over k (routing weights
    # already applied in-kernel; renormalize=False so no further scaling).
    row_of_flat = jnp.zeros((n_rows,), jnp.int32).at[order].set(dest)
    y = jnp.take(y_grouped, row_of_flat, axis=0).astype(jnp.float32)
    y = y.reshape(T, K, H).sum(axis=1)
    return y.astype(x.dtype)


def olmoe_moe_forward(hidden_states, params, top_k):
    """OlmoeMoE.forward: gate -> softmax -> top-k (renormalize=False) -> experts."""
    orig_shape = hidden_states.shape
    H = orig_shape[-1]
    x = hidden_states.reshape(-1, H)

    # Router: tiny [T,H]x[H,E] matmul; softmax / top-k and the expert-grouping
    # permutation stay in XLA (<1% of total FLOPs).
    # TODO(synk): top-k selection and the sort/permute (data-dependent) have no
    # clean Pallas TPU equivalent; done in JAX.
    logits = jnp.dot(x.astype(jnp.float32), params["gate"].astype(jnp.float32).T)
    probs = jax.nn.softmax(logits, axis=-1)
    topk_vals, topk_idx = jax.lax.top_k(probs, top_k)

    # One-time weight preprocessing (in a real deployment this is done once at
    # weight-load time): fuse gate||up and pre-transpose to K-major so both
    # in-kernel matmuls are canonical [M,K]x[K,N] (no in-kernel transposes).
    w13 = jnp.concatenate([params["w1"], params["w3"]], axis=1)    # [E, 2I, H]
    w13_t = jnp.transpose(w13, (0, 2, 1))                          # [E, H, 2I]
    w2_t = jnp.transpose(params["w2"], (0, 2, 1))                  # [E, I, H]

    out = fused_moe_forward(x, topk_vals, topk_idx, w13_t, w2_t)
    return out.reshape(orig_shape)


# ------------------------- pure-JAX reference check ------------------------- #

def olmoe_moe_reference(hidden_states, params, top_k):
    orig_shape = hidden_states.shape
    H = orig_shape[-1]
    x = hidden_states.reshape(-1, H).astype(jnp.float32)
    E = params["gate"].shape[0]
    w1 = params["w1"].astype(jnp.float32)
    w3 = params["w3"].astype(jnp.float32)
    w2 = params["w2"].astype(jnp.float32)
    logits = x @ params["gate"].astype(jnp.float32).T
    probs = jax.nn.softmax(logits, axis=-1)
    topk_vals, topk_idx = jax.lax.top_k(probs, top_k)
    dense = jnp.sum(
        jax.nn.one_hot(topk_idx, E, dtype=jnp.float32) * topk_vals[..., None], axis=1
    )  # [T, E]
    h1 = jnp.einsum("th,eih->eti", x, w1)
    h3 = jnp.einsum("th,eih->eti", x, w3)
    act = (h1 * jax.nn.sigmoid(h1)) * h3
    eo = jnp.einsum("eti,ehi->eth", act, w2)
    out = jnp.einsum("te,eth->th", dense, eo)
    return out.reshape(orig_shape)


# ---------------------------------- main ------------------------------------ #

if __name__ == "__main__":
    # Small synthetic config consistent with OlmoeMoE.__init__
    num_experts = 8
    top_k = 2
    hidden_size = 32
    intermediate_size = 64
    batch, seq = 2, 8

    key = jax.random.PRNGKey(0)
    k_x, k_g, k_w1, k_w3, k_w2 = jax.random.split(key, 5)

    dtype = jnp.bfloat16  # bf16 streaming; f32 accumulation in-kernel
    hidden_states = jax.random.normal(
        k_x, (batch, seq, hidden_size), dtype=jnp.float32).astype(dtype)

    params = {
        "gate": (0.1 * jax.random.normal(
            k_g, (num_experts, hidden_size), dtype=jnp.float32)).astype(dtype),
        "w1": (0.1 * jax.random.normal(
            k_w1, (num_experts, intermediate_size, hidden_size),
            dtype=jnp.float32)).astype(dtype),
        "w3": (0.1 * jax.random.normal(
            k_w3, (num_experts, intermediate_size, hidden_size),
            dtype=jnp.float32)).astype(dtype),
        "w2": (0.1 * jax.random.normal(
            k_w2, (num_experts, hidden_size, intermediate_size),
            dtype=jnp.float32)).astype(dtype),
    }

    out = olmoe_moe_forward(hidden_states, params, top_k)
    out = jax.block_until_ready(out)

    ref = olmoe_moe_reference(hidden_states, params, top_k)
    assert out.shape == hidden_states.shape
    err = float(jnp.max(jnp.abs(out.astype(jnp.float32) - ref)))
    assert err < 2e-2, f"mismatch vs reference: max abs err {err}"

    print("KERNEL_OK")
</pallas_src>

<mosaic_0001>
module attributes {stable_mosaic.version = 11 : i64} {
  func.func @moe_group_kernel(%arg0: i32, %arg1: memref<9xi32, #tpu.memory_space<smem>>, %arg2: memref<1xi32, #tpu.memory_space<smem>>, %arg3: memref<32x32xbf16, #tpu.memory_space<vmem>>, %arg4: memref<32x1xf32, #tpu.memory_space<vmem>>, %arg5: memref<1x32x128xbf16, #tpu.memory_space<vmem>>, %arg6: memref<1x64x32xbf16, #tpu.memory_space<vmem>>, %arg7: memref<32x32xbf16, #tpu.memory_space<vmem>>) attributes {dimension_semantics = [#tpu.dimension_semantics<parallel>], iteration_bounds = array<i64: 9>, scalar_prefetch = 2 : i64, scratch_operands = 0 : i64, tpu.core_type = #tpu.core_type<tc>, window_params = [{transform_indices = @transform_0, window_bounds = array<i64: 32, 32>}, {transform_indices = @transform_1, window_bounds = array<i64: 32, 1>}, {transform_indices = @transform_2, window_bounds = array<i64: 1, 32, 128>}, {transform_indices = @transform_3, window_bounds = array<i64: 1, 64, 32>}, {transform_indices = @transform_4, window_bounds = array<i64: 32, 32>}]} {
    %c0 = arith.constant 0 : index
    %0 = memref.load %arg2[%c0] : memref<1xi32, #tpu.memory_space<smem>>
    %1 = arith.cmpi slt, %arg0, %0 : i32
    %2 = arith.extui %1 : i1 to i32
    %c0_i32 = arith.constant 0 : i32
    %3 = arith.cmpi ne, %2, %c0_i32 : i32
    scf.if %3 {
      %c0_2 = arith.constant 0 : index
      %c0_3 = arith.constant 0 : index
      %8 = vector.load %arg3[%c0_2, %c0_3] : memref<32x32xbf16, #tpu.memory_space<vmem>>, vector<32x32xbf16>
      %c0_4 = arith.constant 0 : index
      %c0_5 = arith.constant 0 : index
      %c0_6 = arith.constant 0 : index
      %9 = vector.load %arg5[%c0_4, %c0_5, %c0_6] : memref<1x32x128xbf16, #tpu.memory_space<vmem>>, vector<1x32x128xbf16>
      %10 = vector.shape_cast %9 : vector<1x32x128xbf16> to vector<32x128xbf16>
      %cst = arith.constant dense<0.000000e+00> : vector<32x128xf32>
      %11 = tpu.matmul %8, %10, %cst {dimension_numbers = #tpu.dot_dimension_numbers<[1], [0], [0], [1], [0, 0, 1, 1], [], []>} : vector<32x32xbf16>, vector<32x128xbf16>, vector<32x128xf32> -> vector<32x128xf32>
      %12 = vector.extract_strided_slice %11 {offsets = [0, 0], sizes = [32, 64], strides = [1, 1]} : vector<32x128xf32> to vector<32x64xf32>
      %13 = vector.extract_strided_slice %11 {offsets = [0, 64], sizes = [32, 64], strides = [1, 1]} : vector<32x128xf32> to vector<32x64xf32>
      %14 = arith.negf %12 : vector<32x64xf32>
      %15 = math.exp %14 : vector<32x64xf32>
      %cst_7 = arith.constant 1.000000e+00 : f32
      %16 = vector.broadcast %cst_7 : f32 to vector<32x64xf32>
      %17 = arith.addf %16, %15 : vector<32x64xf32>
      %18 = arith.divf %16, %17 : vector<32x64xf32>
      %19 = arith.mulf %12, %18 : vector<32x64xf32>
      %20 = arith.mulf %19, %13 : vector<32x64xf32>
      %c0_8 = arith.constant 0 : index
      %c0_9 = arith.constant 0 : index
      %21 = vector.load %arg4[%c0_8, %c0_9] : memref<32x1xf32, #tpu.memory_space<vmem>>, vector<32x1xf32>
      %22 = vector.broadcast %21 : vector<32x1xf32> to vector<32x64xf32>
      %23 = arith.mulf %20, %22 : vector<32x64xf32>
      %24 = arith.truncf %23 : vector<32x64xf32> to vector<32x64xbf16>
      %c0_10 = arith.constant 0 : index
      %c0_11 = arith.constant 0 : index
      %c0_12 = arith.constant 0 : index
      %25 = vector.load %arg6[%c0_10, %c0_11, %c0_12] : memref<1x64x32xbf16, #tpu.memory_space<vmem>>, vector<1x64x32xbf16>
      %26 = vector.shape_cast %25 : vector<1x64x32xbf16> to vector<64x32xbf16>
      %cst_13 = arith.constant dense<0.000000e+00> : vector<32x32xf32>
      %27 = tpu.matmul %24, %26, %cst_13 {dimension_numbers = #tpu.dot_dimension_numbers<[1], [0], [0], [1], [0, 0, 1, 1], [], []>} : vector<32x64xbf16>, vector<64x32xbf16>, vector<32x32xf32> -> vector<32x32xf32>
      %28 = arith.truncf %27 : vector<32x32xf32> to vector<32x32xbf16>
      %c0_14 = arith.constant 0 : index
      %c0_15 = arith.constant 0 : index
      %29 = vector.load %arg7[%c0_14, %c0_15] : memref<32x32xbf16, #tpu.memory_space<vmem>>, vector<32x32xbf16>
      tpu.vector_store %arg7[%c0_14, %c0_15], %28 {strides = array<i32>} : memref<32x32xbf16, #tpu.memory_space<vmem>>, vector<32x32xbf16>,
    } else {
    }
    %c0_0 = arith.constant 0 : index
    %4 = memref.load %arg2[%c0_0] : memref<1xi32, #tpu.memory_space<smem>>
    %5 = arith.cmpi sge, %arg0, %4 : i32
    %6 = arith.extui %5 : i1 to i32
    %c0_i32_1 = arith.constant 0 : i32
    %7 = arith.cmpi ne, %6, %c0_i32_1 : i32
    scf.if %7 {
      %cst = arith.constant 0.000000e+00 : bf16
      %8 = vector.broadcast %cst : bf16 to vector<32x32xbf16>
      %c0_2 = arith.constant 0 : index
      %c0_3 = arith.constant 0 : index
      %9 = vector.load %arg7[%c0_2, %c0_3] : memref<32x32xbf16, #tpu.memory_space<vmem>>, vector<32x32xbf16>
      tpu.vector_store %arg7[%c0_2, %c0_3], %8 {strides = array<i32>} : memref<32x32xbf16, #tpu.memory_space<vmem>>, vector<32x32xbf16>,
    } else {
    }
    return
  }
  func.func @transform_0(%arg0: i32, %arg1: memref<9xi32, #tpu.memory_space<smem>>, %arg2: memref<1xi32, #tpu.memory_space<smem>>) -> (i32, i32) {
    %c0_i32 = arith.constant 0 : i32
    %c0_i32_0 = arith.constant 0 : i32
    return %arg0, %c0_i32 : i32, i32
  }
  func.func @transform_1(%arg0: i32, %arg1: memref<9xi32, #tpu.memory_space<smem>>, %arg2: memref<1xi32, #tpu.memory_space<smem>>) -> (i32, i32) {
    %c0_i32 = arith.constant 0 : i32
    %c0_i32_0 = arith.constant 0 : i32
    return %arg0, %c0_i32 : i32, i32
  }
  func.func @transform_2(%arg0: i32, %arg1: memref<9xi32, #tpu.memory_space<smem>>, %arg2: memref<1xi32, #tpu.memory_space<smem>>) -> (i32, i32, i32) {
    %0 = arith.index_cast %arg0 : i32 to index
    %1 = memref.load %arg1[%0] : memref<9xi32, #tpu.memory_space<smem>>
    %c0_i32 = arith.constant 0 : i32
    %c0_i32_0 = arith.constant 0 : i32
    %c0_i32_1 = arith.constant 0 : i32
    return %1, %c0_i32, %c0_i32_0 : i32, i32, i32
  }
  func.func @transform_3(%arg0: i32, %arg1: memref<9xi32, #tpu.memory_space<smem>>, %arg2: memref<1xi32, #tpu.memory_space<smem>>) -> (i32, i32, i32) {
    %0 = arith.index_cast %arg0 : i32 to index
    %1 = memref.load %arg1[%0] : memref<9xi32, #tpu.memory_space<smem>>
    %c0_i32 = arith.constant 0 : i32
    %c0_i32_0 = arith.constant 0 : i32
    %c0_i32_1 = arith.constant 0 : i32
    return %1, %c0_i32, %c0_i32_0 : i32, i32, i32
  }
  func.func @transform_4(%arg0: i32, %arg1: memref<9xi32, #tpu.memory_space<smem>>, %arg2: memref<1xi32, #tpu.memory_space<smem>>) -> (i32, i32) {
    %c0_i32 = arith.constant 0 : i32
    %c0_i32_0 = arith.constant 0 : i32
    return %arg0, %c0_i32 : i32, i32
  }
}

</mosaic_0001>

<bundles_post_ra>
// kernel: tpu_custom_call.1
= control target key start
LH: loop header
LB: loop body
LE: loop exit
PB: predicated region body
PF: predicated region fallthrough
CT: control target
= control target key end

     0   :  { %s898_s0 = inlined_call_operand.vmem [shape: s32[9], index: 0, kind: input, shape index: {}]   ;;  %s899_s1 = inlined_call_operand.<no memory space> [shape: s32[1], index: 1, kind: input, shape index: {}]   ;;  %s900_s2 = inlined_call_operand.vmem [shape: bf16[288,32], index: 2, kind: input, shape index: {}]   ;;  %s901_s3 = inlined_call_operand.vmem [shape: f32[288,1], index: 3, kind: input, shape index: {}]   ;;  %s902_s4 = inlined_call_operand.vmem [shape: bf16[8,32,128], index: 4, kind: input, shape index: {}]   ;;  %s903_s5 = inlined_call_operand.vmem [shape: bf16[8,64,32], index: 5, kind: input, shape index: {}]   ;;  %s904_s6 = inlined_call_operand.vmem [shape: bf16[288,32], index: 6, kind: output, shape index: {}]  }
   0x1   :  { %s11_s23 = sshll.u32 %s898_s0, 4  ;;  %15 = sst [smem:[#allocation4]] %s899_s1  ;;  %s12_s23 = int_to_ptr.vmem [resolvable:$true] %s11_s23 }
   0x2   :  { %s780_s26 = scalar_lea.vmem %s12_s23, 16  ;;  %p785_p1 = scmp.lt.s32.totalorder %s12_s23, %s12_s23 }
   0x3   :  { %p781_p0 = scmp.ne.s32.totalorder %s12_s23, %s780_s26  ;;  %p786_p2 = scmp.lt.s32.totalorder %s780_s26, %s780_s26 }
   0x5   :  { %p787_p3 = por %p786_p2, %p785_p1 }
   0x7   :  { %p788_p4 = pnand %p787_p3, %p781_p0 }
   0x9   :  { %791 = shalt.err (!%p788_p4)  }
   0xa   :  { %s802_s27 = smov [#allocation3]  }
   0xb   :  { %14 = dma.vmem_to_smem %s12_s23, 16, %s802_s27, [#allocation2] }
   0xc   :  { %796 = dma.done.wait [#allocation2], 16 }
   0xd   :  { %797 = vsyncadd [#allocation2], 4294967280 }
   0xe   :  { %17 = sfence }
   0xf   :  { %s847_s28 = smov 0  }
  0x10 LB: > { %s853_s0 = sadd.s32 4294967295, %s800_s28   ;;  %p671_p5 = scmp.ge.s32.totalorder %s800_s28, 1  ;;  %s800_s28 = sphi %s847_s28, %s23_s28  }
  0x11   : > { %p211_p6 = scmp.lt.s32.totalorder %s800_s28, 10 }
  0x13   : > { %p212_p7 = pnand %p671_p5, %p211_p6 }
  0x14   : > { %s672_s1 = sshll.u32 (!%p212_p7), %s853_s0, 2  ;;  %s266_s29 = sld [smem:[#allocation3 + %s853_s0]] (!%p212_p7) }
  0x15   : > { %215 = sbr.rel (%p212_p7) target bundleno = 617 (0x269), region = 36  ;;  %p255_p8 = scmp.lt.s32.totalorder (!%p212_p7), %s672_s1, 35 }
  0x16   : > { %s273_s30 = sld [smem:[#allocation3 + %s853_s0]] (!%p212_p7) }
  0x17   : > { %s287_s7 = sld [smem:[#allocation4]] (!%p212_p7) }
  0x1a   : > { %p267_p9 = scmp.lt.s32.totalorder (!%p212_p7), %s266_s29, 7 }
  0x1c   : > { %s906_s1 = smov (!%p255_p8, %s672_s1), 35  ;;  %p274_p10 = scmp.lt.s32.totalorder %s273_s30, 7 }
  0x1d   : > { %s673_s8 = sshll.u32 %s906_s1, 2  ;;  %s675_s9 = sshll.u32 %s906_s1, 3 }
  0x1e   : > { %s258_s12 = scalar_lea.vmem %s900_s2, %s673_s8  ;;  %s264_s15 = scalar_lea.vmem %s901_s3, %s675_s9 }
  0x1f   : > { %s869_s18 = scalar_lea.vmem %s904_s6, %s673_s8  ;;  %s908_s29 = smov (!%p267_p9, %s266_s29), 7 }
  0x20   : > { %s910_s30 = smov (!%p274_p10, %s273_s30), 7  ;;  %s706_s19 = sshll.u32 %s908_s29, 4 }
  0x21   : > { %s271_s22 = scalar_lea.vmem %s902_s4, %s706_s19  ;;  %s707_s23 = sshll.u32 %s910_s30, 5 }
  0x22   : > { %s877_s26 = scalar_lea.vmem %s903_s5, %s707_s23  ;;  %p682_p11 = scmp.ge.s32.totalorder %s853_s0, %s287_s7 }
  0x23   : > { %v756_v0 = vld [vmem:[%s271_s22] sm:$0xff] (!%p682_p11)   ;;  %vm322_vm0 = vcmask (!%p682_p11), 261120   ;;  %v757_v1 = vld [vmem:[%s271_s22 + $0x8] sm:$0xff] (!%p682_p11)   ;;  %v803_v3 = vmov (!%p682_p11), 0   ;;  %v428_v5 = vld [vmem:[%s264_s15 + $0x10] sm:$0xff] (!%p682_p11)  ;;  %s804_s27 = smov (!%p682_p11), 64  }
  0x24   : > { %291 = sbr.rel (%p682_p11) target bundleno = 602 (0x25a), region = 40  ;;  %722 = vmatprep.subr.bf16.mxu0 (!%p682_p11), %v756_v0  ;;  %v758_v2 = vld [vmem:[%s258_s12] sm:$0xff] (!%p682_p11)   ;;  %755 = vset.pattern.permute.xlu1 (!%p682_p11), %v803_v3  ;;  %v759_v4 = vld [vmem:[%s258_s12 + $0x8] sm:$0xff] (!%p682_p11)   ;;  %v429_v7 = vld [vmem:[%s264_s15 + $0x18] sm:$0xff] (!%p682_p11)  ;;  %vm488_vm1 = vcmask (!%p682_p11), 523264   ;;  %vm560_vm2 = vcmask (!%p682_p11), 257024  }
  0x25   : > { %723 = vmatpush3.bf16.msra.mxu0 (!%p682_p11), %v756_v0  ;;  %754 = vset.pattern.permute.xlu0 (!%p682_p11), %v803_v3  ;;  %v426_v6 = vld [vmem:[%s264_s15] sm:$0xff] (!%p682_p11)  ;;  %v427_v8 = vld [vmem:[%s264_s15 + $0x8] sm:$0xff] (!%p682_p11)  ;;  %v762_v11 = vld [vmem:[%s877_s26 + $0x10] sm:$0xff] (!%p682_p11)  }
  0x26   : > { %724 = vmatprep.subr.bf16.mxu0 (!%p682_p11), %v757_v1  ;;  %726 = vmatprep.mubr.msk.bf16.mxu0 (!%p682_p11), %vm322_vm0, %v758_v2  ;;  %v760_v9 = vld [vmem:[%s877_s26] sm:$0xff] (!%p682_p11)   ;;  %v761_v10 = vld [vmem:[%s877_s26 + $0x8] sm:$0xff] (!%p682_p11)   ;;  %v763_v12 = vld [vmem:[%s877_s26 + $0x18] sm:$0xff] (!%p682_p11)  }
  0x27   : > { %442 = vperm.xlu1 (!%p682_p11), %755, %v428_v5   ;;  %432 = vperm.xlu0 (!%p682_p11), %754, %v426_v6  }
  0x28   : > { %730 = vmatprep.subr.bf16.mxu1 (!%p682_p11), %v760_v9 }
  0x29   : > { %725 = vmatpush3.bf16.msra.mxu0 (!%p682_p11), %v757_v1  ;;  %731 = vmatpush3.bf16.msra.mxu1 (!%p682_p11), %v760_v9 }
  0x2a   : > { %732 = vmatprep.subr.bf16.mxu1 (!%p682_p11), %v761_v10 }
  0x2b   : > { %447 = vperm.xlu1 %755, %v429_v7   ;;  %437 = vperm.xlu0 %754, %v427_v8  }
  0x2c   : > { %727 = vmatmul.mubr.msk.bf16.vlgmr.msra.gmra.mrb[0].mxu0 %vm322_vm0, %v759_v4 }
  0x2d   : > { %733 = vmatpush3.bf16.msra.mxu1 %v761_v10 }
  0x2e   : > { %734 = vmatprep.subr.bf16.mxu1 %v762_v11 }
  0x31   : > { %735 = vmatpush3.bf16.msra.mxu1 %v762_v11 }
  0x32   : > { %736 = vmatprep.subr.bf16.mxu1 %v763_v12 }
  0x35   : > { %737 = vmatpush3.bf16.msra.mxu1 %v763_v12 }
  0xa6   : > { %v433_v29 = vpop.permute.xlu0 %432  ;;  %v443_v30 = vpop.permute.xlu1 %442 }
  0xaa   : > { %v438_v32 = vpop.permute.xlu0 %437  ;;  %v448_v34 = vpop.permute.xlu1 %447 }
  0xff   : > { %v728_v13 = vpop.f32.mrb[0].mxu0 }
 0x100   : > { %v363_v14 = vpop.f32.mrb[1].mxu0  ;;  %v691_v19 = vmul.f32 -1.442695, %v728_v13 }
 0x101   : > { %410 = vrot.lane.b32.xlu0 %v363_v14, %s804_s27  ;;  %v729_v15 = vpop.f32.mrb[2].mxu0  ;;  %v689_v17 = vmul.f32 -1.442695, %v363_v14 }
 0x102   : > { %v366_v16 = vpop.f32.mrb[3].mxu0  ;;  %v692_v20 = vmul.f32 -1.442695, %v729_v15 }
 0x103   : > { %412 = vrot.lane.b32.xlu1 %v366_v16, %s804_s27  ;;  %v690_v18 = vmul.f32 -1.442695, %v366_v16  ;;  %764 = vpow2.f32 %v689_v17 }
 0x105   : > { %414 = vrot.lane.b32.xlu0 %v728_v13, %s804_s27  ;;  %766 = vpow2.f32 %v690_v18 }
 0x106   : > { %768 = vpow2.f32 %v691_v19 }
 0x107   : > { %416 = vrot.lane.b32.xlu1 %v729_v15, %s804_s27  ;;  %770 = vpow2.f32 %v692_v20 }
 0x10d   : > { %v765_v21 = vpop.eup %764 }
 0x10e   : > { %v390_v23 = vadd.f32 1.0, %v765_v21 }
 0x10f   : > { %v767_v22 = vpop.eup %766 }
 0x110   : > { %v769_v24 = vpop.eup %768  ;;  %v391_v25 = vadd.f32 1.0, %v767_v22  ;;  %772 = vrcp.f32 %v390_v23 }
 0x111   : > { %v771_v26 = vpop.eup %770  ;;  %v392_v27 = vadd.f32 1.0, %v769_v24 }
 0x112   : > { %v393_v28 = vadd.f32 1.0, %v771_v26  ;;  %774 = vrcp.f32 %v391_v25 }
 0x113   : > { %776 = vrcp.f32 %v392_v27 }
 0x114   : > { %778 = vrcp.f32 %v393_v28 }
 0x11a   : > { %v773_v31 = vpop.eup %772 }
 0x11b   : > { %v402_v35 = vmul.f32 %v773_v31, %v363_v14 }
 0x11c   : > { %v775_v33 = vpop.eup %774 }
 0x11d   : > { %v777_v36 = vpop.eup %776  ;;  %v403_v38 = vmul.f32 %v775_v33, %v366_v16 }
 0x11e   : > { %v779_v40 = vpop.eup %778  ;;  %v404_v43 = vmul.f32 %v777_v36, %v728_v13 }
 0x11f   : > { %v405_v48 = vmul.f32 %v779_v40, %v729_v15 }
 0x173   : > { %v411_v37 = vpop.permute.xlu0 %410 }
 0x174   : > { %v422_v39 = vmul.f32 %v411_v37, %v402_v35 }
 0x175   : > { %v413_v41 = vpop.permute.xlu1 %412 }
 0x176   : > { %v423_v42 = vmul.f32 %v413_v41, %v403_v38  ;;  %v450_v45 = vmul.f32 %v433_v29, %v422_v39 }
 0x177   : > { %v415_v44 = vpop.permute.xlu0 %414 }
 0x178   : > { %v451_v46 = vmul.f32 %v438_v32, %v423_v42  ;;  %v424_v47 = vmul.f32 %v415_v44, %v404_v43 }
 0x179   : > { %v417_v49 = vpop.permute.xlu1 %416 }
 0x17a   : > { %v425_v50 = vmul.f32 %v417_v49, %v405_v48  ;;  %v454_v51 = vpack.c.bf16 %v451_v46, %v450_v45  ;;  %v452_v52 = vmul.f32 %v443_v30, %v424_v47 }
 0x17c   : > { %v453_v53 = vmul.f32 %v448_v34, %v425_v50  ;;  %738 = vmatprep.mubr.msk.bf16.mxu1 %vm488_vm1, %v454_v51 }
 0x17e   : > { %v455_v54 = vpack.c.bf16 %v453_v53, %v452_v52 }
 0x180   : > { %739 = vmatmul.mubr.msk.bf16.vlgmr.msra.gmra.mrb[0].mxu1 %vm488_vm1, %v455_v54 }
 0x253   : > { %v740_v55 = vpop.f32.mrb[0].mxu1 }
 0x254   : > { %v710_v56 = vpack.c.bf16 %v740_v55, %v740_v55  ;;  %v529_v57 = vpop.f32.mrb[1].mxu1 }
 0x255   : > { %v708_v58 = vpack.c.bf16 %v529_v57, %v529_v57  ;;  %v741_v59 = vpop.f32.mrb[2].mxu1 }
 0x256   : > { %563 = vst.msk [vmem:[%s869_s18 + $0x8] sm:$0xf] %vm560_vm2, %v710_v56  ;;  %v711_v60 = vpack.c.bf16 %v741_v59, %v741_v59  ;;  %v532_v61 = vpop.f32.mrb[3].mxu1 }
 0x257   : > { %561 = vst.msk [vmem:[%s869_s18] sm:$0xf] %vm560_vm2, %v708_v58  ;;  %v709_v62 = vpack.c.bf16 %v532_v61, %v532_v61 }
 0x258   : > { %564 = vst.msk [vmem:[%s869_s18 + $0xc] sm:$0xf] %vm560_vm2, %v711_v60 }
 0x259   : > { %562 = vst.msk [vmem:[%s869_s18 + $0x4] sm:$0xf] %vm560_vm2, %v709_v62 }
 0x25a PF: > { %s565_s1 = sld [smem:[#allocation4]] }
 0x260   : > { %p703_p12 = scmp.lt.s32.totalorder %s853_s0, %s565_s1 }
 0x261   : > { %vm570_vm3 = vcmask (!%p703_p12), 257024   ;;  %v805_v63 = vmov (!%p703_p12), 0  }
 0x262   : > { %569 = sbr.rel (%p703_p12) target bundleno = 617 (0x269), region = 44  ;;  %571 = vst.msk [vmem:[%s869_s18] sm:$0xf] (!%p703_p12), %vm570_vm3, %v805_v63  ;;  %572 = vst.msk [vmem:[%s869_s18 + $0x4] sm:$0xf] (!%p703_p12), %vm570_vm3, %v805_v63 }
 0x263   : > { %573 = vst.msk [vmem:[%s869_s18 + $0x8] sm:$0xf] (!%p703_p12), %vm570_vm3, %v805_v63  ;;  %574 = vst.msk [vmem:[%s869_s18 + $0xc] sm:$0xf] (!%p703_p12), %vm570_vm3, %v805_v63 }
 0x269 PF: > { %s23_s28 = sadd.s32 1, %s800_s28  }
 0x26a   : > { %p20_p13 = scmp.ge.s32.totalorder %s23_s28, 11  }
 0x26c   :  { %22 = sbr.rel (!%p20_p13) target bundleno = 16 (0x10), region = 83 }

</bundles_post_ra>
